<compile_context>
chip_gen: v6e
topology: v6e:2x2x1
jax: 0.10.0
libtpu: 0.0.40
codegen_flags: <defaults>
</compile_context>

<pallas_src>
import jax
import jax.numpy as jnp
from jax import lax
from jax.experimental import pallas as pl
from jax.experimental.pallas import tpu as pltpu

C_IN = 1
C_OUT = 10
K = 5
LANE = 128


def conv_gemm_kernel(wb_ref, patches_ref, out_ref):
    """One MXU pass: (C_OUT, K*K+1) @ (K*K+1, N_pad) -> (C_OUT, N_pad).

    wb_ref      : VMEM f32 (C_OUT, K*K + 1)   row c = [w[c].ravel(), bias[c]]
    patches_ref : VMEM f32 (K*K + 1, N_pad)   im2col columns, last row = ones
    out_ref     : VMEM     (C_OUT, N_pad)     lane-dense output slab
    """
    out_ref[...] = jnp.dot(
        wb_ref[...], patches_ref[...],
        preferred_element_type=jnp.float32,
    ).astype(out_ref.dtype)


def edge_case_model_forward(x, conv_weight, conv_bias):
    """Pallas equivalent of EdgeCaseModel().forward(x) with default flags."""
    b, c_in, h, w = x.shape
    assert c_in == C_IN
    c_out, _, kh, kw = conv_weight.shape
    assert (kh, kw) == (K, K)
    oh, ow = h - kh + 1, w - kw + 1
    n = b * oh * ow
    n_pad = pl.cdiv(n, LANE) * LANE  # lane-dense, unmasked stores

    # ---- host-side layout plumbing (im2col + param packing) ----
    x_sq = x.reshape(b, h, w).astype(jnp.float32)
    taps = [x_sq[:, i:i + oh, j:j + ow] for i in range(kh) for j in range(kw)]
    patches = jnp.stack(taps, axis=0).reshape(kh * kw, n)          # (25, N)
    patches = jnp.concatenate(
        [patches, jnp.ones((1, n), jnp.float32)], axis=0)          # bias row
    patches = jnp.pad(patches, ((0, 0), (0, n_pad - n)))           # (26, N_pad)

    wb = jnp.concatenate(
        [conv_weight.reshape(c_out, kh * kw), conv_bias.reshape(c_out, 1)],
        axis=1).astype(jnp.float32)                                # (10, 26)

    cost = pl.CostEstimate(
        flops=2 * c_out * (kh * kw + 1) * n_pad,
        transcendentals=0,
        bytes_accessed=4 * (wb.size + patches.size + c_out * n_pad))

    out_slab = pl.pallas_call(
        conv_gemm_kernel,
        out_shape=jax.ShapeDtypeStruct((c_out, n_pad), x.dtype),
        in_specs=[
            pl.BlockSpec(memory_space=pltpu.MemorySpace.VMEM),  # packed params
            pl.BlockSpec(memory_space=pltpu.MemorySpace.VMEM),  # im2col patches
        ],
        out_specs=pl.BlockSpec(memory_space=pltpu.MemorySpace.VMEM),
        cost_estimate=cost,
    )(wb, patches)

    # Slice off lane padding, back to NCHW.
    out = out_slab[:, :n].reshape(c_out, b, oh, ow).transpose(1, 0, 2, 3)
    # self.model = LayerWithRidiculouslyLongNameAndDoesntDoAnything() == Identity.
    return out


if __name__ == "__main__":
    key = jax.random.PRNGKey(0)
    k_x, k_w, k_b = jax.random.split(key, 3)

    B, H, W = 2, 16, 16
    x = jax.random.normal(k_x, (B, C_IN, H, W), jnp.float32)

    # PyTorch Conv2d default init: U(-1/sqrt(fan_in), 1/sqrt(fan_in)), fan_in = 25.
    bound = 1.0 / float((C_IN * K * K) ** 0.5)
    conv_w = jax.random.uniform(k_w, (C_OUT, C_IN, K, K), jnp.float32, -bound, bound)
    conv_b = jax.random.uniform(k_b, (C_OUT,), jnp.float32, -bound, bound)

    out = edge_case_model_forward(x, conv_w, conv_b)
    out = jax.block_until_ready(out)
    assert out.shape == (B, C_OUT, H - K + 1, W - K + 1)

    # Pure-JAX reference for correctness.
    ref = lax.conv_general_dilated(
        x, conv_w, window_strides=(1, 1), padding="VALID",
        dimension_numbers=("NCHW", "OIHW", "NCHW")) + conv_b.reshape(1, C_OUT, 1, 1)
    assert jnp.allclose(out, ref, atol=1e-4, rtol=1e-4), float(jnp.max(jnp.abs(out - ref)))

    # TODO(synk): throw_error / return_str / return_class branches return
    # non-tensor values (exception, python str, class object); only the default
    # tensor path (conv -> identity) is implemented.
    print("KERNEL_OK")
</pallas_src>

<mosaic_0001>
module attributes {stable_mosaic.version = 11 : i64} {
  func.func @conv_gemm_kernel(%arg0: memref<10x26xf32, #tpu.memory_space<vmem>>, %arg1: memref<26x384xf32, #tpu.memory_space<vmem>>, %arg2: memref<10x384xf32, #tpu.memory_space<vmem>>) attributes {dimension_semantics = [], scalar_prefetch = 0 : i64, scratch_operands = 0 : i64, tpu.core_type = #tpu.core_type<tc>} {
    %c0 = arith.constant 0 : index
    %c0_0 = arith.constant 0 : index
    %0 = vector.load %arg0[%c0, %c0_0] : memref<10x26xf32, #tpu.memory_space<vmem>>, vector<10x26xf32>
    %c0_1 = arith.constant 0 : index
    %c0_2 = arith.constant 0 : index
    %1 = vector.load %arg1[%c0_1, %c0_2] : memref<26x384xf32, #tpu.memory_space<vmem>>, vector<26x384xf32>
    %cst = arith.constant dense<0.000000e+00> : vector<10x384xf32>
    %2 = tpu.matmul %0, %1, %cst {dimension_numbers = #tpu.dot_dimension_numbers<[1], [0], [0], [1], [0, 0, 1, 1], [], []>} : vector<10x26xf32>, vector<26x384xf32>, vector<10x384xf32> -> vector<10x384xf32>
    %c0_3 = arith.constant 0 : index
    %c0_4 = arith.constant 0 : index
    %3 = vector.load %arg2[%c0_3, %c0_4] : memref<10x384xf32, #tpu.memory_space<vmem>>, vector<10x384xf32>
    tpu.vector_store %arg2[%c0_3, %c0_4], %2 {strides = array<i32>} : memref<10x384xf32, #tpu.memory_space<vmem>>, vector<10x384xf32>,
    return
  }
}

</mosaic_0001>

<bundles_post_ra>
// kernel: tpu_custom_call.1
= control target key start
LH: loop header
LB: loop body
LE: loop exit
PB: predicated region body
PF: predicated region fallthrough
CT: control target
= control target key end

     0   :  { %7 = vsyncpa [#allocation3], 0  ;;  %s383_s0 = inlined_call_operand.hbm [shape: f32[10,26], index: 0, kind: input, shape index: {}]   ;;  %s384_s1 = inlined_call_operand.hbm [shape: f32[26,384], index: 1, kind: input, shape index: {}]   ;;  %s385_s2 = inlined_call_operand.hbm [shape: f32[10,384], index: 2, kind: output, shape index: {}]  }
   0x1   :  { %8 = vsyncpa [#allocation6], 0 }
   0x2   :  { %9 = vsyncpa [#allocation4], 0  ;;  %s345_s9 = smov [#allocation2]  }
   0x3   :  { %s15_s10 = sshll.u32 %s345_s9, 4  ;;  %s16_s10 = int_to_ptr.vmem [resolvable:$true] %s15_s10 }
   0x4   :  { %s287_s11 = scalar_lea.vmem %s16_s10, 256  ;;  %p292_p1 = scmp.lt.s32.totalorder %s16_s10, %s16_s10 }
   0x5   :  { %p288_p0 = scmp.ne.s32.totalorder %s16_s10, %s287_s11  ;;  %p293_p2 = scmp.lt.s32.totalorder %s287_s11, %s287_s11 }
   0x7   :  { %p294_p3 = por %p293_p2, %p292_p1 }
   0x9   :  { %p295_p4 = pnand %p294_p3, %p288_p0 }
   0xb   :  { %298 = shalt.err (!%p295_p4)
}
   0xc   :  { %s346_s12 = smov 128   ;;  %s347_s13 = smov 8  }
   0xd   :  { %21 = dma.hbm_to_vmem [thread:$0]  %s383_s0, 256, %s16_s10, [#allocation3], %s346_s12, %s346_s12, %s347_s13  }
   0xe   :  { %s348_s16 = smov [#allocation5]  }
   0xf   :  { %s27_s17 = sshll.u32 %s348_s16, 4  ;;  %s28_s17 = int_to_ptr.vmem [resolvable:$true] %s27_s17 }
  0x10   :  { %s307_s18 = scalar_lea.vmem %s28_s17, 1536  ;;  %p312_p6 = scmp.lt.s32.totalorder %s28_s17, %s28_s17 }
  0x11   :  { %p308_p5 = scmp.ne.s32.totalorder %s28_s17, %s307_s18  ;;  %p313_p7 = scmp.lt.s32.totalorder %s307_s18, %s307_s18 }
  0x13   :  { %p314_p8 = por %p313_p7, %p312_p6 }
  0x15   :  { %p315_p9 = pnand %p314_p8, %p308_p5 }
  0x17   :  { %318 = shalt.err (!%p315_p9)
}
  0x18   :  { %s349_s19 = smov 384   ;;  %s350_s20 = smov 24  }
  0x19   :  { %33 = dma.hbm_to_vmem [thread:$0]  %s384_s1, 1536, %s28_s17, [#allocation6], %s349_s19, %s349_s19, %s350_s20  }
  0x1a   :  { %339 = dma.done.wait [#allocation3], 256  }
  0x1b   :  { %340 = vsyncadd [#allocation3], 4294967040 }
  0x1c   :  { %341 = dma.done.wait [#allocation6], 1536  }
  0x1d   :  { %342 = vsyncadd [#allocation6], 4294965760  ;;  %v351_v0 = vmov 0.0   ;;  %vm61_vm0 = vcmask 1041408   ;;  %v52_v1 = vld [vmem:[#allocation5 + $0x50] sm:$0x3] }
  0x1e   :  { %135 = vmatprep.mubr.f32.mxu0 %v351_v0  ;;  %v51_v2 = vld [vmem:[#allocation5 + $0x48] sm:$0x3]  ;;  %v49_v3 = vld [vmem:[#allocation5 + $0x38] sm:$0xff]  ;;  %247 = vmatprep.subr.msk.mxu0 %vm61_vm0, %v52_v1  ;;  %v48_v5 = vld [vmem:[#allocation5 + $0x30] sm:$0xff]  ;;  %vm54_vm1 = vcmask 211968   ;;  %s352_s0 = smov [#allocation7]  }
  0x1f   :  { %v53_v4 = vld [vmem:[#allocation5 + $0x58] sm:$0x3]  ;;  %248 = vmatpush1.msk.msra.mxu0 %vm61_vm0, %v51_v2  ;;  %v46_v6 = vld [vmem:[#allocation5 + $0x20] sm:$0xff]  ;;  %v47_v9 = vld [vmem:[#allocation5 + $0x28] sm:$0xff]  ;;  %s234_s1 = sshll.u32 %s352_s0, 4  ;;  %s235_s1 = int_to_ptr.vmem [resolvable:$true] %s234_s1 }
  0x20   :  { %260 = vmatprep.subr.msk.mxu1 %vm61_vm0, %v53_v4  ;;  %v50_v7 = vld [vmem:[#allocation5 + $0x40] sm:$0xff]  ;;  %97 = vmatprep.subr.mxu0 %v49_v3  ;;  %v45_v8 = vld [vmem:[#allocation5 + $0x18] sm:$0xff]  ;;  %v43_v10 = vld [vmem:[#allocation5 + $0x8] sm:$0xff]  ;;  %s319_s23 = scalar_lea.vmem %s235_s1, 768  ;;  %p324_p11 = scmp.lt.s32.totalorder %s235_s1, %s235_s1 }
  0x21   :  { %261 = vmatpush3.msk.msra.mxu1 %vm61_vm0, %v53_v4  ;;  %98 = vmatpush1.msra.mxu0 %v48_v5  ;;  %v42_v11 = vld [vmem:[#allocation5] sm:$0xff]  ;;  %v44_v12 = vld [vmem:[#allocation5 + $0x10] sm:$0xff]  ;;  %v41_v14 = vld [vmem:[#allocation2 + $0x8] sm:$0x3]  ;;  %p320_p10 = scmp.ne.s32.totalorder %s235_s1, %s319_s23  ;;  %p325_p12 = scmp.lt.s32.totalorder %s319_s23, %s319_s23 }
  0x22   :  { %262 = vmatprep.subr.mxu1 %v50_v7  ;;  %99 = vmatprep.subr.mxu0 %v46_v6  ;;  %v40_v13 = vld [vmem:[#allocation2] sm:$0xff] }
  0x23   :  { %263 = vmatpush3.msra.mxu1 %v50_v7  ;;  %100 = vmatpush1.msra.mxu0 %v45_v8  ;;  %p326_p13 = por %p325_p12, %p324_p11 }
  0x24   :  { %264 = vmatprep.subr.mxu1 %v47_v9  ;;  %101 = vmatprep.subr.mxu0 %v43_v10 }
  0x25   :  { %265 = vmatpush3.msra.mxu1 %v47_v9  ;;  %102 = vmatpush1.msra.mxu0 %v42_v11  ;;  %p327_p0 = pnand %p326_p13, %p320_p10 }
  0x26   :  { %266 = vmatprep.subr.mxu1 %v44_v12  ;;  %249 = vmatmul.mubr.msk.f32.vlgmr.msra.gmra.mxu0 %vm54_vm1, %v40_v13 }
  0x27   :  { %267 = vmatpush3.msra.mxu1 %v44_v12  ;;  %268 = vmatprep.mubr.msk.f32.mxu1 %vm54_vm1, %v40_v13 }
  0x28   :  { %141 = vmatprep.mubr.f32.mxu0 %v351_v0  ;;  %269 = vmatmul.mubr.msk.f32.vlgmr.msra.gmra.mxu1 %vm54_vm1, %v41_v14 }
  0x2a   :  { %250 = vmatmul.mubr.msk.f32.gmra.mxu0 %vm54_vm1, %v41_v14 }
  0xe6   :  { %v137_v15 = vpop.f32.mrf.mxu0 }
  0xe7   :  { %223 = vst [vmem:[#allocation7] sm:$0xff] %v137_v15 }
  0xe8   :  { %v139_v16 = vpop.f32.mrf.mxu0  ;;  %v270_v17 = vpop.f32.mrf.mxu1 }
  0xe9   :  { %224 = vst [vmem:[#allocation7 + $0x8] sm:$0xff] %v139_v16  ;;  %228 = vst [vmem:[#allocation7 + $0x28] sm:$0x3] %v270_v17 }
  0xea   :  { %v143_v18 = vpop.f32.mrf.mxu0  ;;  %v214_v19 = vpop.f32.mrf.mxu1 }
  0xeb   :  { %226 = vst [vmem:[#allocation7 + $0x18] sm:$0x3] %v143_v18  ;;  %225 = vst [vmem:[#allocation7 + $0x10] sm:$0xff] %v214_v19 }
  0xec   :  { %v145_v20 = vpop.f32.mrf.mxu0 }
  0xed   :  { %227 = vst [vmem:[#allocation7 + $0x20] sm:$0x3] %v145_v20 }
  0xee   :  { %330 = shalt.err (!%p327_p0)
}
  0xef   :  { %240 = dma.vmem_to_hbm [thread:$0]  %s235_s1, 768, %s385_s2, [#allocation4], %s349_s19, %s349_s19, %s350_s20  }
  0xf0   :  { %343 = dma.done.wait [#allocation4], 768  }
  0xf1   :  { %344 = vsyncadd [#allocation4], 4294966528 }
  0xf2   :  { %244 = vsyncpa [#allocation3], 1 }
  0xf3   :  { %245 = vsyncpa [#allocation6], 1 }
  0xf4   :  { %246 = vsyncpa [#allocation4], 1 }

</bundles_post_ra>
